<compile_context>
chip_gen: v6e
topology: v6e:2x2x1
jax: 0.10.0
libtpu: 0.0.40
codegen_flags: <defaults>
</compile_context>

<pallas_src>
import jax
import jax.numpy as jnp
from jax.experimental import pallas as pl
from jax.experimental.pallas import tpu as pltpu

ALPHA = 0.25
GAMMA = 2.0
SMOOTH = 1e-5

_PAD_LABEL = 2          # sentinel for padded pixels (valid labels are {0,1})
_SUB = 8                # sublane rows per block
_LANE = 128             # lane width
_MINI = _SUB * _LANE    # 1024: smallest lane-dense unit
_MAX_LANE_MULT = 256    # lanes per block <= 128*256 (1 MiB f32 per channel chunk)


def _focal_dice_kernel(x_ref, lab_ref, out_ref):
    """One (column-chunk, sample) step; both channels fused.

    x_ref  : (2, 8, lanes) f32  -- logits, channels 0 and 1 of this chunk
    lab_ref: (8, lanes)    i32  -- labels (0/1; _PAD_LABEL marks padding)
    out_ref: (3, 128)      f32  -- row 0: sum focal, row 1: sum p*t, row 2: sum p+t
    """
    lab = lab_ref[...]
    valid = (lab != _PAD_LABEL).astype(jnp.float32)

    def per_channel(c):
        x = x_ref[c]                                    # (8, lanes)
        t = (lab == c).astype(jnp.float32)              # in-kernel one-hot
        # sigmoid and the stable BCEWithLogits share one exp().
        e = jnp.exp(-jnp.abs(x))
        inv = 1.0 / (1.0 + e)   # v7x option: pl.reciprocal(1.0 + e, approx=True)
        p = jnp.where(x >= 0.0, inv, e * inv)           # sigmoid(x)
        ce = jnp.maximum(x, 0.0) - x * t + jnp.log1p(e)
        # gamma == 2:  alpha = 0.75 - 0.5*t ;  (1 - pt) = p + t - 2*p*t
        one_m_pt = p + t - 2.0 * p * t
        focal = (0.75 - 0.5 * t) * (one_m_pt * one_m_pt) * ce
        pm = p * valid                                  # masked probs (pad -> 0)
        return focal * valid, pm * t, pm + t

    f0, i0, d0 = per_channel(0)
    f1, i1, d1 = per_channel(1)
    f_sum = jnp.sum(f0 + f1)
    i_sum = jnp.sum(i0 + i1)
    d_sum = jnp.sum(d0 + d1)

    # Single lane-dense output block: partials live in lane 0 of rows 0/1/2
    # (the remaining lanes are a harmless broadcast of the same scalar).
    row = jax.lax.broadcasted_iota(jnp.int32, (3, _LANE), 0)
    out_ref[...] = jnp.where(row == 0, f_sum,
                             jnp.where(row == 1, i_sum, d_sum))


@jax.jit
def focal_loss_with_dice(logits, label):
    """logits: (N, 2, H, W) float; label: (N, H, W) or (N, 1, H, W) in {0, 1}."""
    n, ch, h, w = logits.shape
    assert ch == 2, "one_hot(num_classes=2) implies C == 2"
    if label.ndim == 4:
        label = jnp.squeeze(label, axis=1)
    hw = h * w

    # Block sizing: chunks of 8 x (128*d) elements, d <= _MAX_LANE_MULT, chunk
    # count balanced so tiles never degenerate to (8, 128) for awkward H*W.
    q = -(-hw // _MINI)                      # ceil(hw / 1024) mini tiles
    jt = -(-q // _MAX_LANE_MULT)             # number of column chunks
    d = -(-q // jt)                          # mini tiles per chunk (<= 256)
    lanes = d * _LANE
    chunk = _SUB * lanes
    hwp = jt * chunk

    x = logits.astype(jnp.float32).reshape(n, 2, hw)
    lab = label.astype(jnp.int32).reshape(n, hw)
    if hwp != hw:                            # pad only when actually required
        x = jnp.pad(x, ((0, 0), (0, 0), (0, hwp - hw)))
        lab = jnp.pad(lab, ((0, 0), (0, hwp - hw)), constant_values=_PAD_LABEL)
    x = x.reshape(n, 2, jt, _SUB, lanes)
    lab = lab.reshape(n, jt, _SUB, lanes)

    grid = (jt, n)                           # every step writes its own block

    parts = pl.pallas_call(
        _focal_dice_kernel,
        out_shape=jax.ShapeDtypeStruct((jt, n, 3, _LANE), jnp.float32),
        grid_spec=pltpu.PrefetchScalarGridSpec(
            num_scalar_prefetch=0,
            grid=grid,
            in_specs=[
                # logits: both channel planes of one chunk per step
                pl.BlockSpec((None, 2, None, _SUB, lanes),
                             lambda j, s: (s, 0, j, 0, 0)),
                # labels: the matching chunk, read once per step
                pl.BlockSpec((None, None, _SUB, lanes),
                             lambda j, s: (s, j, 0, 0)),
            ],
            out_specs=pl.BlockSpec((None, None, 3, _LANE),
                                   lambda j, s: (j, s, 0, 0)),
        ),
        compiler_params=pltpu.CompilerParams(
            # v7x: if the trace shows a single TC active, use CORE_PARALLEL here.
            dimension_semantics=("parallel", "parallel"),
            vmem_limit_bytes=32 * 1024 * 1024,
        ),
    )(x, lab)

    # Tiny final combine on (jt, n) partials in plain JAX.
    focal_mean = jnp.sum(parts[:, :, 0, 0]) / jnp.float32(n * 2 * hw)
    inter_s = jnp.sum(parts[:, :, 1, 0], axis=0)         # (n,)
    den_s = jnp.sum(parts[:, :, 2, 0], axis=0)           # (n,)
    dice = (2.0 * inter_s + SMOOTH) / (den_s + SMOOTH)
    dice_loss = 1.0 - jnp.sum(dice) / jnp.float32(n)
    return 0.5 * focal_mean + 0.5 * dice_loss


def _reference(logits, label):
    """Pure-JAX reference mirroring the PyTorch forward."""
    n, c, h, w = logits.shape
    if label.ndim == 4:
        label = jnp.squeeze(label, axis=1)
    target = jax.nn.one_hot(label.astype(jnp.int32), 2, dtype=jnp.float32)
    target = jnp.transpose(target, (0, 3, 1, 2))
    alpha = jnp.where(target == 1, ALPHA, 1 - ALPHA)
    probs = jax.nn.sigmoid(logits)
    pt = jnp.where(target == 1, probs, 1 - probs)
    ce = jnp.maximum(logits, 0) - logits * target + jnp.log1p(
        jnp.exp(-jnp.abs(logits)))
    focal = jnp.mean(alpha * (1 - pt) ** GAMMA * ce)
    p = probs.reshape(n, -1)
    t = target.reshape(n, -1)
    inter = jnp.sum(p * t, axis=1)
    dice = (2.0 * inter + SMOOTH) / (jnp.sum(p, 1) + jnp.sum(t, 1) + SMOOTH)
    dice_loss = 1.0 - jnp.sum(dice) / n
    return 0.5 * focal + 0.5 * dice_loss


if __name__ == "__main__":
    key = jax.random.PRNGKey(0)
    k1, k2 = jax.random.split(key)
    N, C, H, W = 2, 2, 16, 16            # C=2 implied by one_hot(num_classes=2)
    logits = jax.random.normal(k1, (N, C, H, W), dtype=jnp.float32)
    label = jax.random.randint(k2, (N, H, W), 0, 2, dtype=jnp.int32)

    loss = jax.block_until_ready(focal_loss_with_dice(logits, label))

    ref = _reference(logits, label)
    assert jnp.allclose(loss, ref, rtol=1e-5, atol=1e-5), (loss, ref)
    print("KERNEL_OK")
</pallas_src>

<mosaic_0001>
module attributes {stable_mosaic.version = 11 : i64} {
  func.func @_focal_dice_kernel(%arg0: i32, %arg1: i32, %arg2: memref<1x2x1x8x128xf32, #tpu.memory_space<vmem>>, %arg3: memref<1x1x8x128xi32, #tpu.memory_space<vmem>>, %arg4: memref<1x1x3x128xf32, #tpu.memory_space<vmem>>) attributes {dimension_semantics = [#tpu.dimension_semantics<parallel>, #tpu.dimension_semantics<parallel>], iteration_bounds = array<i64: 1, 2>, scalar_prefetch = 0 : i64, scratch_operands = 0 : i64, tpu.core_type = #tpu.core_type<tc>, window_params = [{transform_indices = @transform_0, window_bounds = array<i64: 1, 2, 1, 8, 128>}, {transform_indices = @transform_1, window_bounds = array<i64: 1, 1, 8, 128>}, {transform_indices = @transform_2, window_bounds = array<i64: 1, 1, 3, 128>}]} {
    %c0 = arith.constant 0 : index
    %c0_0 = arith.constant 0 : index
    %c0_1 = arith.constant 0 : index
    %c0_2 = arith.constant 0 : index
    %0 = vector.load %arg3[%c0, %c0_0, %c0_1, %c0_2] : memref<1x1x8x128xi32, #tpu.memory_space<vmem>>, vector<1x1x8x128xi32>
    %1 = vector.shape_cast %0 : vector<1x1x8x128xi32> to vector<8x128xi32>
    %c2_i32 = arith.constant 2 : i32
    %2 = vector.broadcast %c2_i32 : i32 to vector<8x128xi32>
    %3 = arith.cmpi ne, %1, %2 : vector<8x128xi32>
    %4 = arith.extui %3 : vector<8x128xi1> to vector<8x128xi32>
    %5 = arith.sitofp %4 : vector<8x128xi32> to vector<8x128xf32>
    %c0_3 = arith.constant 0 : index
    %c0_4 = arith.constant 0 : index
    %c0_5 = arith.constant 0 : index
    %c0_6 = arith.constant 0 : index
    %c0_7 = arith.constant 0 : index
    %6 = vector.load %arg2[%c0_3, %c0_4, %c0_5, %c0_6, %c0_7] : memref<1x2x1x8x128xf32, #tpu.memory_space<vmem>>, vector<1x1x1x8x128xf32>
    %7 = vector.shape_cast %6 : vector<1x1x1x8x128xf32> to vector<8x128xf32>
    %c0_i32 = arith.constant 0 : i32
    %8 = vector.broadcast %c0_i32 : i32 to vector<8x128xi32>
    %9 = arith.cmpi eq, %1, %8 : vector<8x128xi32>
    %10 = arith.extui %9 : vector<8x128xi1> to vector<8x128xi32>
    %11 = arith.sitofp %10 : vector<8x128xi32> to vector<8x128xf32>
    %12 = math.absf %7 : vector<8x128xf32>
    %cst = arith.constant 0.000000e+00 : f32
    %13 = vector.broadcast %cst : f32 to vector<8x128xf32>
    %14 = arith.subf %13, %12 : vector<8x128xf32>
    %15 = math.exp %14 : vector<8x128xf32>
    %cst_8 = arith.constant 1.000000e+00 : f32
    %16 = vector.broadcast %cst_8 : f32 to vector<8x128xf32>
    %17 = arith.addf %16, %15 : vector<8x128xf32>
    %cst_9 = arith.constant 1.000000e+00 : f32
    %18 = vector.broadcast %cst_9 : f32 to vector<8x128xf32>
    %19 = arith.divf %18, %17 : vector<8x128xf32>
    %cst_10 = arith.constant 0.000000e+00 : f32
    %20 = vector.broadcast %cst_10 : f32 to vector<8x128xf32>
    %21 = arith.cmpf oge, %7, %20 : vector<8x128xf32>
    %22 = arith.mulf %15, %19 : vector<8x128xf32>
    %23 = arith.select %21, %19, %22 : vector<8x128xi1>, vector<8x128xf32>
    %cst_11 = arith.constant 0.000000e+00 : f32
    %24 = vector.broadcast %cst_11 : f32 to vector<8x128xf32>
    %25 = arith.maximumf %7, %24 : vector<8x128xf32>
    %26 = arith.mulf %7, %11 : vector<8x128xf32>
    %27 = arith.subf %25, %26 : vector<8x128xf32>
    %28 = math.log1p %15 : vector<8x128xf32>
    %29 = arith.addf %27, %28 : vector<8x128xf32>
    %30 = arith.addf %23, %11 : vector<8x128xf32>
    %cst_12 = arith.constant 2.000000e+00 : f32
    %31 = vector.broadcast %cst_12 : f32 to vector<8x128xf32>
    %32 = arith.mulf %31, %23 : vector<8x128xf32>
    %33 = arith.mulf %32, %11 : vector<8x128xf32>
    %34 = arith.subf %30, %33 : vector<8x128xf32>
    %cst_13 = arith.constant 5.000000e-01 : f32
    %35 = vector.broadcast %cst_13 : f32 to vector<8x128xf32>
    %36 = arith.mulf %35, %11 : vector<8x128xf32>
    %cst_14 = arith.constant 7.500000e-01 : f32
    %37 = vector.broadcast %cst_14 : f32 to vector<8x128xf32>
    %38 = arith.subf %37, %36 : vector<8x128xf32>
    %39 = arith.mulf %34, %34 : vector<8x128xf32>
    %40 = arith.mulf %38, %39 : vector<8x128xf32>
    %41 = arith.mulf %40, %29 : vector<8x128xf32>
    %42 = arith.mulf %23, %5 : vector<8x128xf32>
    %43 = arith.mulf %41, %5 : vector<8x128xf32>
    %44 = arith.mulf %42, %11 : vector<8x128xf32>
    %45 = arith.addf %42, %11 : vector<8x128xf32>
    %c0_15 = arith.constant 0 : index
    %c1 = arith.constant 1 : index
    %c0_16 = arith.constant 0 : index
    %c0_17 = arith.constant 0 : index
    %c0_18 = arith.constant 0 : index
    %46 = vector.load %arg2[%c0_15, %c1, %c0_16, %c0_17, %c0_18] : memref<1x2x1x8x128xf32, #tpu.memory_space<vmem>>, vector<1x1x1x8x128xf32>
    %47 = vector.shape_cast %46 : vector<1x1x1x8x128xf32> to vector<8x128xf32>
    %c1_i32 = arith.constant 1 : i32
    %48 = vector.broadcast %c1_i32 : i32 to vector<8x128xi32>
    %49 = arith.cmpi eq, %1, %48 : vector<8x128xi32>
    %50 = arith.extui %49 : vector<8x128xi1> to vector<8x128xi32>
    %51 = arith.sitofp %50 : vector<8x128xi32> to vector<8x128xf32>
    %52 = math.absf %47 : vector<8x128xf32>
    %cst_19 = arith.constant 0.000000e+00 : f32
    %53 = vector.broadcast %cst_19 : f32 to vector<8x128xf32>
    %54 = arith.subf %53, %52 : vector<8x128xf32>
    %55 = math.exp %54 : vector<8x128xf32>
    %cst_20 = arith.constant 1.000000e+00 : f32
    %56 = vector.broadcast %cst_20 : f32 to vector<8x128xf32>
    %57 = arith.addf %56, %55 : vector<8x128xf32>
    %cst_21 = arith.constant 1.000000e+00 : f32
    %58 = vector.broadcast %cst_21 : f32 to vector<8x128xf32>
    %59 = arith.divf %58, %57 : vector<8x128xf32>
    %cst_22 = arith.constant 0.000000e+00 : f32
    %60 = vector.broadcast %cst_22 : f32 to vector<8x128xf32>
    %61 = arith.cmpf oge, %47, %60 : vector<8x128xf32>
    %62 = arith.mulf %55, %59 : vector<8x128xf32>
    %63 = arith.select %61, %59, %62 : vector<8x128xi1>, vector<8x128xf32>
    %cst_23 = arith.constant 0.000000e+00 : f32
    %64 = vector.broadcast %cst_23 : f32 to vector<8x128xf32>
    %65 = arith.maximumf %47, %64 : vector<8x128xf32>
    %66 = arith.mulf %47, %51 : vector<8x128xf32>
    %67 = arith.subf %65, %66 : vector<8x128xf32>
    %68 = math.log1p %55 : vector<8x128xf32>
    %69 = arith.addf %67, %68 : vector<8x128xf32>
    %70 = arith.addf %63, %51 : vector<8x128xf32>
    %cst_24 = arith.constant 2.000000e+00 : f32
    %71 = vector.broadcast %cst_24 : f32 to vector<8x128xf32>
    %72 = arith.mulf %71, %63 : vector<8x128xf32>
    %73 = arith.mulf %72, %51 : vector<8x128xf32>
    %74 = arith.subf %70, %73 : vector<8x128xf32>
    %cst_25 = arith.constant 5.000000e-01 : f32
    %75 = vector.broadcast %cst_25 : f32 to vector<8x128xf32>
    %76 = arith.mulf %75, %51 : vector<8x128xf32>
    %cst_26 = arith.constant 7.500000e-01 : f32
    %77 = vector.broadcast %cst_26 : f32 to vector<8x128xf32>
    %78 = arith.subf %77, %76 : vector<8x128xf32>
    %79 = arith.mulf %74, %74 : vector<8x128xf32>
    %80 = arith.mulf %78, %79 : vector<8x128xf32>
    %81 = arith.mulf %80, %69 : vector<8x128xf32>
    %82 = arith.mulf %63, %5 : vector<8x128xf32>
    %83 = arith.mulf %81, %5 : vector<8x128xf32>
    %84 = arith.mulf %82, %51 : vector<8x128xf32>
    %85 = arith.addf %82, %51 : vector<8x128xf32>
    %86 = arith.addf %43, %83 : vector<8x128xf32>
    %87 = vector.shape_cast %86 : vector<8x128xf32> to vector<1x8x128xf32>
    %cst_27 = arith.constant dense<0.000000e+00> : vector<1xf32>
    %88 = vector.multi_reduction <add>, %87, %cst_27 [1, 2] : vector<1x8x128xf32> to vector<1xf32>
    %89 = vector.shape_cast %88 : vector<1xf32> to vector<1x1x1xf32>
    %90 = vector.extract %89[0, 0, 0] : f32 from vector<1x1x1xf32>
    %91 = arith.addf %44, %84 : vector<8x128xf32>
    %92 = vector.shape_cast %91 : vector<8x128xf32> to vector<1x8x128xf32>
    %cst_28 = arith.constant dense<0.000000e+00> : vector<1xf32>
    %93 = vector.multi_reduction <add>, %92, %cst_28 [1, 2] : vector<1x8x128xf32> to vector<1xf32>
    %94 = vector.shape_cast %93 : vector<1xf32> to vector<1x1x1xf32>
    %95 = vector.extract %94[0, 0, 0] : f32 from vector<1x1x1xf32>
    %96 = arith.addf %45, %85 : vector<8x128xf32>
    %97 = vector.shape_cast %96 : vector<8x128xf32> to vector<1x8x128xf32>
    %cst_29 = arith.constant dense<0.000000e+00> : vector<1xf32>
    %98 = vector.multi_reduction <add>, %97, %cst_29 [1, 2] : vector<1x8x128xf32> to vector<1xf32>
    %99 = vector.shape_cast %98 : vector<1xf32> to vector<1x1x1xf32>
    %100 = vector.extract %99[0, 0, 0] : f32 from vector<1x1x1xf32>
    %101 = tpu.iota {dimensions = array<i32: 0>} : vector<3x128xi32>
    %c0_i32_30 = arith.constant 0 : i32
    %102 = vector.broadcast %c0_i32_30 : i32 to vector<3x128xi32>
    %103 = arith.cmpi eq, %101, %102 : vector<3x128xi32>
    %c1_i32_31 = arith.constant 1 : i32
    %104 = vector.broadcast %c1_i32_31 : i32 to vector<3x128xi32>
    %105 = arith.cmpi eq, %101, %104 : vector<3x128xi32>
    %106 = vector.broadcast %95 : f32 to vector<3x128xf32>
    %107 = vector.broadcast %100 : f32 to vector<3x128xf32>
    %108 = arith.select %105, %106, %107 : vector<3x128xi1>, vector<3x128xf32>
    %109 = vector.broadcast %90 : f32 to vector<3x128xf32>
    %110 = arith.select %103, %109, %108 : vector<3x128xi1>, vector<3x128xf32>
    %c0_32 = arith.constant 0 : index
    %c0_33 = arith.constant 0 : index
    %c0_34 = arith.constant 0 : index
    %c0_35 = arith.constant 0 : index
    %111 = vector.load %arg4[%c0_32, %c0_33, %c0_34, %c0_35] : memref<1x1x3x128xf32, #tpu.memory_space<vmem>>, vector<1x1x3x128xf32>
    %112 = vector.shape_cast %111 : vector<1x1x3x128xf32> to vector<3x128xf32>
    %113 = vector.shape_cast %110 : vector<3x128xf32> to vector<1x1x3x128xf32>
    tpu.vector_store %arg4[%c0_32, %c0_33, %c0_34, %c0_35], %113 {strides = array<i32>} : memref<1x1x3x128xf32, #tpu.memory_space<vmem>>, vector<1x1x3x128xf32>,
    return
  }
  func.func @transform_0(%arg0: i32, %arg1: i32) -> (i32, i32, i32, i32, i32) {
    %c0_i32 = arith.constant 0 : i32
    %c0_i32_0 = arith.constant 0 : i32
    %c0_i32_1 = arith.constant 0 : i32
    %c0_i32_2 = arith.constant 0 : i32
    return %arg1, %c0_i32, %arg0, %c0_i32_0, %c0_i32_1 : i32, i32, i32, i32, i32
  }
  func.func @transform_1(%arg0: i32, %arg1: i32) -> (i32, i32, i32, i32) {
    %c0_i32 = arith.constant 0 : i32
    %c0_i32_0 = arith.constant 0 : i32
    %c0_i32_1 = arith.constant 0 : i32
    return %arg1, %arg0, %c0_i32, %c0_i32_0 : i32, i32, i32, i32
  }
  func.func @transform_2(%arg0: i32, %arg1: i32) -> (i32, i32, i32, i32) {
    %c0_i32 = arith.constant 0 : i32
    %c0_i32_0 = arith.constant 0 : i32
    %c0_i32_1 = arith.constant 0 : i32
    return %arg0, %arg1, %c0_i32, %c0_i32_0 : i32, i32, i32, i32
  }
}

</mosaic_0001>

<bundles_post_ra>
// kernel: focal_loss_with_dice.1
= control target key start
LH: loop header
LB: loop body
LE: loop exit
PB: predicated region body
PF: predicated region fallthrough
CT: control target
= control target key end

     0   :  { %s525_s9 = smov 0   ;;  %s527_s10 = smov 0   ;;  %s594_s0 = inlined_call_operand.vmem [shape: f32[2,2,1,8,128], index: 0, kind: input, shape index: {}]   ;;  %s595_s1 = inlined_call_operand.vmem [shape: s32[2,1,8,128], index: 1, kind: input, shape index: {}]   ;;  %s596_s2 = inlined_call_operand.vmem [shape: f32[1,2,3,128], index: 2, kind: output, shape index: {}]  }
   0x1   :  { %s529_s11 = smov 0  }
   0x2 LB: > { %s21_s12 = sadd.s32 1, %s503_s10  ;;  %p430_p0 = scmp.ge.s32.totalorder %s507_s11, 1  ;;  %s507_s11 = sphi %s529_s11, %s12_s11   ;;  %s503_s10 = sphi %s527_s10, %s602_s10   ;;  %s499_s9 = sphi %s525_s9, %s601_s9  }
   0x3   : > { %p22_p1 = scmp.ge.s32.totalorder %s21_s12, 2  ;;  %p145_p2 = scmp.lt.s32.totalorder %s507_s11, 3 }
   0x5   : > { %s604_s12 = smov (%p22_p1, %s21_s12), 0  ;;  %p146_p3 = pnand %p430_p0, %p145_p2 }
   0x6   : > { %p180_p4 = scmp.lt.s32.totalorder (!%p146_p3), %s499_s9, 1 }
   0x7   : > { %149 = sbr.rel (%p146_p3) target bundleno = 281 (0x119), region = 28 }
   0xc   : > { %s606_s9 = smov (!%p180_p4, %s499_s9), 1  ;;  %v509_v16 = vmov 0.0  }
   0xd   : > { %s441_s13 = sshll.u32 %s606_s9, 4  ;;  %s433_s17 = sshll.u32 %s606_s9, 3 }
   0xe   : > { %s187_s16 = scalar_lea.vmem %s594_s0, %s441_s13  ;;  %s194_s20 = scalar_lea.vmem %s595_s1, %s433_s17 }
   0xf   : > { %v549_v0 = vld [vmem:[%s187_s16] sm:$0xff]  ;;  %v551_v1 = vld [vmem:[%s187_s16 + $0x8] sm:$0xff]  ;;  %s434_s22 = sshll.u32 %s606_s9, 2 }
  0x10   : > { %v211_v2 = vand.u32 2147483647, %v549_v0  ;;  %v252_v3 = vand.u32 2147483647, %v551_v1  ;;  %v203_v12 = vld [vmem:[%s194_s20] sm:$0xff]  ;;  %vm218_vm3 = vcmp.ge.f32.partialorder %v549_v0, 0.0  ;;  %s202_s27 = scalar_lea.vmem %s596_s2, %s434_s22 }
  0x11   : > { %vm204_vm0 = vcmp.ne.s32.totalorder %v203_v12, 2  ;;  %vm208_vm1 = vcmp.eq.s32.totalorder %v203_v12, 0  ;;  %vm249_vm2 = vcmp.eq.s32.totalorder %v203_v12, 1  ;;  %vm259_vm4 = vcmp.ge.f32.partialorder %v551_v1, 0.0 }
  0x12   : > { %v212_v4 = vsub.f32 0.0, %v211_v2  ;;  %v253_v5 = vsub.f32 0.0, %v252_v3  ;;  %v435_v17 = vsel %vm204_vm0, 1.0, %v509_v16  ;;  %v436_v18 = vsel %vm208_vm1, 1.0, %v509_v16 }
  0x13   : > { %v438_v22 = vsel %vm249_vm2, 1.0, %v509_v16  ;;  %v221_v23 = vmax.f32 %v549_v0, 0.0  ;;  %v222_v24 = vmul.f32 %v436_v18, %v549_v0  ;;  %v238_v27 = vmul.f32 0.5, %v436_v18 }
  0x14   : > { %v213_v6 = vmul.f32 1.442695, %v212_v4  ;;  %v254_v7 = vmul.f32 1.442695, %v253_v5  ;;  %v262_v28 = vmax.f32 %v551_v1, 0.0  ;;  %v263_v33 = vmul.f32 %v438_v22, %v551_v1 }
  0x15   : > { %v279_v34 = vmul.f32 0.5, %v438_v22  ;;  %v223_v49 = vsub.f32 %v221_v23, %v222_v24  ;;  %v239_v57 = vsub.f32 0.75, %v238_v27 }
  0x16   : > { %473 = vpow2.f32 %v213_v6  ;;  %v264_v54 = vsub.f32 %v262_v28, %v263_v33  ;;  %v318_v33 = vlaneseq }
  0x17   : > { %475 = vpow2.f32 %v254_v7  ;;  %v280_v61 = vsub.f32 0.75, %v279_v34 }
  0x18   : > { %v319_v34 = vshrl.u32 %v318_v33, 7 }
  0x1a   : > { %vm321_vm7 = vcmp.eq.s32.totalorder %v319_v34, 1  ;;  %vm320_vm8 = vcmp.eq.s32.totalorder %v319_v34, 0 }
  0x23   : > { %v474_v8 = vpop.eup %473 }
  0x24   : > { %v476_v9 = vpop.eup %475  ;;  %v215_v10 = vadd.f32 1.0, %v474_v8  ;;  %v227_v13 = vmul.f32 -0.5, %v474_v8  ;;  %v230_v15 = vand.u32 2147483647, %v474_v8 }
  0x25   : > { %v256_v11 = vadd.f32 1.0, %v476_v9  ;;  %v268_v14 = vmul.f32 -0.5, %v476_v9  ;;  %v271_v29 = vand.u32 2147483647, %v476_v9 }
  0x26   : > { %477 = vrcp.f32 %v215_v10  ;;  %v228_v19 = vadd.f32 1.0, %v227_v13  ;;  %vm564_vm5 = vcmp.lt.f32.partialorder %v230_v15, 0.0004427343 }
  0x27   : > { %479 = vrcp.f32 %v256_v11  ;;  %v269_v20 = vadd.f32 1.0, %v268_v14  ;;  %vm573_vm6 = vcmp.lt.f32.partialorder %v271_v29, 0.0004427343 }
  0x28   : > { %481 = vlog2.f32 %v215_v10  ;;  %v229_v38 = vmul.f32 %v474_v8, %v228_v19 }
  0x29   : > { %483 = vlog2.f32 %v256_v11  ;;  %v270_v39 = vmul.f32 %v476_v9, %v269_v20 }
  0x33   : > { %v478_v21 = vpop.eup %477 }
  0x34   : > { %v480_v25 = vpop.eup %479  ;;  %v219_v26 = vmul.f32 %v478_v21, %v474_v8 }
  0x35   : > { %v482_v30 = vpop.eup %481  ;;  %v260_v31 = vmul.f32 %v480_v25, %v476_v9 }
  0x36   : > { %v484_v35 = vpop.eup %483  ;;  %v220_v36 = vsel %vm218_vm3, %v478_v21, %v219_v26  ;;  %v226_v37 = vmul.f32 0.6931472, %v482_v30 }
  0x37   : > { %v243_v40 = vmul.f32 %v435_v17, %v220_v36  ;;  %v261_v41 = vsel %vm259_vm4, %v480_v25, %v260_v31  ;;  %v234_v42 = vadd.f32 %v436_v18, %v220_v36  ;;  %v235_v43 = vmul.f32 2.0, %v220_v36 }
  0x38   : > { %v275_v44 = vadd.f32 %v438_v22, %v261_v41  ;;  %v276_v45 = vmul.f32 2.0, %v261_v41  ;;  %v284_v46 = vmul.f32 %v435_v17, %v261_v41  ;;  %v267_v51 = vmul.f32 0.6931472, %v484_v35 }
  0x39   : > { %v246_v48 = vadd.f32 %v436_v18, %v243_v40  ;;  %v236_v50 = vmul.f32 %v436_v18, %v235_v43  ;;  %v232_v53 = vsel %vm564_vm5, %v229_v38, %v226_v37  ;;  %v245_v8 = vmul.f32 %v436_v18, %v243_v40 }
  0x3a   : > { %v287_v52 = vadd.f32 %v438_v22, %v284_v46  ;;  %v277_v55 = vmul.f32 %v438_v22, %v276_v45  ;;  %v273_v58 = vsel %vm573_vm6, %v270_v39, %v267_v51  ;;  %v233_v62 = vadd.f32 %v232_v53, %v223_v49 }
  0x3b   : > { %v237_v56 = vsub.f32 %v234_v42, %v236_v50  ;;  %v274_v0 = vadd.f32 %v273_v58, %v264_v54  ;;  %v286_v9 = vmul.f32 %v438_v22, %v284_v46 }
  0x3c   : > { %v308_v59 = vadd.f32 %v287_v52, %v246_v48  ;;  %v278_v60 = vsub.f32 %v275_v44, %v277_v55 }
  0x3d   : > { %v240_v63 = vmul.f32 %v237_v56, %v237_v56  ;;  %v298_v11 = vadd.f32 %v286_v9, %v245_v8 }
  0x3e   : > { %309 = vadd.xlane.f32.xlu1 %v308_v59  ;;  %v281_v1 = vmul.f32 %v278_v60, %v278_v60 }
  0x3f   : > { %v241_v2 = vmul.f32 %v240_v63, %v239_v57 }
  0x40   : > { %v282_v3 = vmul.f32 %v281_v1, %v280_v61 }
  0x41   : > { %v242_v4 = vmul.f32 %v241_v2, %v233_v62 }
  0x42   : > { %v283_v5 = vmul.f32 %v282_v3, %v274_v0 }
  0x43   : > { %v244_v6 = vmul.f32 %v435_v17, %v242_v4 }
  0x44   : > { %v285_v7 = vmul.f32 %v435_v17, %v283_v5 }
  0x46   : > { %v288_v10 = vadd.f32 %v285_v7, %v244_v6 }
  0x48   : > { %289 = vadd.xlane.f32.xlu0 %v288_v10 }
  0x4c   : > { %299 = vadd.xlane.f32.xlu0 %v298_v11 }
  0xc7   : > { %v310_v12 = vpop.xlane.xlu1 %309 }
  0xc8   : > { %v311_v13 = vrot.slane %v310_v12, 4 }
  0xca   : > { %v312_v14 = vadd.f32 %v311_v13, %v310_v12 }
  0xcc   : > { %v313_v20 = vrot.slane %v312_v14, 2 }
  0xce   : > { %v314_v17 = vadd.f32 %v313_v20, %v312_v14 }
  0xd0   : > { %v315_v29 = vrot.slane %v314_v17, 1 }
  0xd1   : > { %v290_v15 = vpop.xlane.xlu0 %289 }
  0xd2   : > { %v291_v16 = vrot.slane %v290_v15, 4  ;;  %v316_v32 = vadd.f32 %v315_v29, %v314_v17 }
  0xd4   : > { %v292_v19 = vadd.f32 %v291_v16, %v290_v15 }
  0xd5   : > { %v300_v21 = vpop.xlane.xlu0 %299 }
  0xd6   : > { %v293_v23 = vrot.slane %v292_v19, 2  ;;  %v301_v24 = vrot.slane %v300_v21, 4 }
  0xd8   : > { %v302_v25 = vadd.f32 %v301_v24, %v300_v21  ;;  %v294_v26 = vadd.f32 %v293_v23, %v292_v19 }
  0xda   : > { %v303_v18 = vrot.slane %v302_v25, 2  ;;  %v295_v22 = vrot.slane %v294_v26, 1 }
  0xdc   : > { %v304_v27 = vadd.f32 %v303_v18, %v302_v25  ;;  %v296_v28 = vadd.f32 %v295_v22, %v294_v26 }
  0xde   : > { %442 = vpush %v296_v28  ;;  %v305_v30 = vrot.slane %v304_v27, 1 }
  0xe0   : > { %v306_v31 = vadd.f32 %v305_v30, %v304_v27 }
  0xe2   : > { %444 = vpush %v306_v31 }
  0xe3   : > { %446 = vpush %v316_v32 }
 0x10f   : > { %s443_s21 = spop %442 }
 0x110   : > { %v325_v37 = vstv %s443_s21 }
 0x113   : > { %s445_s23 = spop %444 }
 0x114   : > { %v322_v35 = vstv %s445_s23  ;;  %s447_s24 = spop %446 }
 0x115   : > { %v323_v36 = vstv %s447_s24 }
 0x116   : > { %v324_v38 = vsel %vm321_vm7, %v322_v35, %v323_v36 }
 0x117   : > { %v326_v39 = vsel %vm320_vm8, %v325_v37, %v324_v38 }
 0x118   : > { %327 = vst [vmem:[%s202_s27] sm:$0x7] %v326_v39 }
 0x119 PF: > { %s12_s11 = sadd.s32 1, %s507_s11   ;;  %s601_s9 = smov %s503_s10 }
 0x11a   : > { %p9_p5 = scmp.ge.s32.totalorder %s12_s11, 4   ;;  %s602_s10 = smov %s604_s12 }
 0x11c   :  { %11 = sbr.rel (!%p9_p5) target bundleno = 2 (0x2), region = 62 }

</bundles_post_ra>
